<compile_context>
chip_gen: v6e
topology: v6e:2x2x1
jax: 0.10.0
libtpu: 0.0.40
codegen_flags: <defaults>
</compile_context>

<pallas_src>
import jax
import jax.numpy as jnp
from jax.experimental import pallas as pl
from jax.experimental.pallas import tpu as pltpu


def _round_up(x, m):
    return ((x + m - 1) // m) * m


def _tpu_generation():
    """Best-effort TPU generation from device_kind (0 if unknown)."""
    try:
        kind = jax.devices()[0].device_kind.lower()
    except Exception:
        return 0
    for tag, gen in (("v7", 7), ("7x", 7), ("v6", 6), ("v5", 5), ("v4", 4)):
        if tag in kind:
            return gen
    return 0


def _vmem_plan(gen):
    """(block-sizing budget bytes, vmem_limit_bytes) per TPU generation."""
    # v5e: scoped default is 16 MiB -> stay modest; v6e: 128 MiB physical -> go
    # big; v7x: 64 MiB physical with double-buffered I/O blocks -> headroom.
    budget = {7: 24 << 20, 6: 56 << 20, 5: 12 << 20}.get(gen, 12 << 20)
    limit = {7: 32 << 20, 6: 64 << 20, 5: 32 << 20}.get(gen, 32 << 20)
    return budget, limit


def _choose_block_batch(N, L, C_in, C_out, K, budget_bytes, num_cores):
    """Sequences per grid step: biggest block fitting the VMEM budget; only
    reserve >= num_cores grid steps when the chip actually has multiple TCs."""
    weight_bytes = 4 * (K * C_in * C_out + K * C_out * C_out
                        + C_in * C_out + 4 * C_out)
    # per-sequence: double-buffered x + two f32 output blocks, plus in-kernel
    # temporaries (bf16 im2col slabs, f32 activations / residual).
    per_seq = (2 * 4 * L * C_in + 2 * 2 * 4 * L * C_out
               + 2 * L * K * (C_in + C_out) + 4 * L * (C_in + 3 * C_out))
    avail = max(budget_bytes - weight_bytes, 1 << 20)
    cap = max(1, avail // max(per_seq, 1))
    target = min(N, cap, 32)          # 32 caps the unrolled per-sequence loop
    if num_cores > 1 and N >= num_cores:
        target = min(target, max(1, N // num_cores))
    bt = 1
    for cand in range(1, int(target) + 1):
        if N % cand == 0:
            bt = cand
    return bt


def _make_temporal_block_kernel(Bt, L, K, d, C_in, C_out, has_downsample,
                                compute_dtype):
    """Builds the per-grid-step kernel (all sizes static / baked in)."""
    p = d * (K - 1)                                  # causal left pad (torch `padding`)
    pad = _round_up(p, 128) if p > 0 else 0          # lane-aligned zero block
    shifts = [d * (K - 1 - k) for k in range(K)]     # delay of tap k

    def im2col(v):
        # v: (C, L) compute_dtype.  Returns (K*C, L): row block k holds v
        # delayed by shifts[k] time steps (zeros flow in from the left ->
        # causal / chomped conv).  One zero block + K static slices; the K
        # taps are fused along the contraction axis for a single matmul.
        if p == 0:
            taps = [v] * K
        else:
            c = v.shape[0]
            ve = jnp.concatenate([jnp.zeros((c, pad), v.dtype), v], axis=1)
            taps = [ve[:, pad - s:pad - s + L] for s in shifts]
        return taps[0] if K == 1 else jnp.concatenate(taps, axis=0)

    def kernel(x_ref, w1_ref, b1_ref, w2_ref, b2_ref, *rest):
        if has_downsample:
            wd_ref, bd_ref, out_ref, act_ref = rest
        else:
            out_ref, act_ref = rest

        w1 = w1_ref[...]          # (C_out, K*C_in)  compute_dtype
        w2 = w2_ref[...]          # (C_out, K*C_out) compute_dtype
        b1 = b1_ref[...]          # (C_out, 1) f32
        b2 = b2_ref[...]

        # TODO(synk): dropout1/dropout2 omitted (inference / eval semantics).
        for b in range(Bt):                       # static unroll over sequences
            x_b = x_ref[b]                        # (C_in, L) f32
            xb = x_b.astype(compute_dtype)        # cast ONCE per conv input

            # conv1 -> chomp -> relu : one fused im2col matmul
            h1 = jnp.dot(w1, im2col(xb),
                         preferred_element_type=jnp.float32) + b1
            h1 = jnp.maximum(h1, 0.0)             # (C_out, L) f32

            # conv2 -> chomp -> relu : operands built from h1 directly in vregs
            out_b = jnp.dot(w2, im2col(h1.astype(compute_dtype)),
                            preferred_element_type=jnp.float32) + b2
            out_b = jnp.maximum(out_b, 0.0)       # (C_out, L) f32

            # residual path
            if has_downsample:
                res = jnp.dot(wd_ref[...], xb,
                              preferred_element_type=jnp.float32) + bd_ref[...]
            else:
                res = x_b                         # bit-exact identity residual

            out_ref[b] = out_b                    # stores lane-dense along L
            act_ref[b] = jnp.maximum(out_b + res, 0.0)

    return kernel


def temporal_block_forward(x_ncl, params, *, kernel_size, stride, dilation,
                           padding, compute_dtype=jnp.bfloat16,
                           block_batch=None):
    """x_ncl: (N, C_in, L) float32, PyTorch Conv1d layout.
    Returns (out, relu(out + res)), each (N, C_out, L) float32 (same pair as
    torch TemporalBlock.forward; drop the first output if unused to halve the
    HBM write traffic)."""
    assert stride == 1, "TCN TemporalBlock uses stride=1"
    assert padding == dilation * (kernel_size - 1), \
        "causal residual add requires padding == dilation * (kernel_size - 1)"

    N, C_in, L = x_ncl.shape
    K, d = kernel_size, dilation

    # ---- parameter glue (plain JAX; weight_norm materialized, im2col layout) ----
    def weight_norm_eff(v, g):
        # v: (C_out, C, K) torch layout, g: (C_out,)
        v = v.astype(jnp.float32)
        norm = jnp.sqrt(jnp.sum(v * v, axis=(1, 2), keepdims=True))
        w = (g.astype(jnp.float32)[:, None, None] / norm) * v      # (C_out, C, K)
        # contraction index of the fused matmul is k*C + c (matches im2col rows)
        w = jnp.transpose(w, (0, 2, 1)).reshape(w.shape[0], -1)    # (C_out, K*C)
        return w.astype(compute_dtype)

    w1 = weight_norm_eff(params["conv1_v"], params["conv1_g"])
    w2 = weight_norm_eff(params["conv2_v"], params["conv2_g"])
    C_out = w1.shape[0]
    b1 = params["conv1_b"].reshape(C_out, 1).astype(jnp.float32)
    b2 = params["conv2_b"].reshape(C_out, 1).astype(jnp.float32)

    has_downsample = (C_in != C_out)     # matches the torch module construction

    gen = _tpu_generation()
    budget, vmem_limit = _vmem_plan(gen)
    num_cores = 2 if gen >= 7 else 1
    Bt = (_choose_block_batch(N, L, C_in, C_out, K, budget, num_cores)
          if block_batch is None else block_batch)
    assert N % Bt == 0, "block_batch must divide the batch size"
    # TODO(synk): for N == 1 on v7x, add a second parallel grid axis tiling L
    # (with a d*(K-1) causal halo) so both TensorCores get work.

    x = x_ncl.astype(jnp.float32)        # native (N, C, L); no wrapper transpose

    operands = [x, w1, b1, w2, b2]
    if has_downsample:
        wd = params["down_w"][:, :, 0].astype(compute_dtype)        # (C_out, C_in)
        bd = params["down_b"].reshape(C_out, 1).astype(jnp.float32)
        operands += [wd, bd]

    kernel = _make_temporal_block_kernel(Bt, L, K, d, C_in, C_out,
                                         has_downsample, compute_dtype)

    def _run(weight_mode):
        def cspec(shape):
            idx = (lambda i, _n=len(shape): (0,) * _n)
            if weight_mode is None:
                return pl.BlockSpec(shape, idx)
            return pl.BlockSpec(shape, idx, pipeline_mode=weight_mode)

        in_specs = [pl.BlockSpec((Bt, C_in, L), lambda i: (i, 0, 0)),
                    cspec((C_out, K * C_in)), cspec((C_out, 1)),
                    cspec((C_out, K * C_out)), cspec((C_out, 1))]
        if has_downsample:
            in_specs += [cspec((C_out, C_in)), cspec((C_out, 1))]

        return pl.pallas_call(
            kernel,
            out_shape=(jax.ShapeDtypeStruct((N, C_out, L), jnp.float32),
                       jax.ShapeDtypeStruct((N, C_out, L), jnp.float32)),
            grid_spec=pltpu.PrefetchScalarGridSpec(
                num_scalar_prefetch=0,
                grid=(N // Bt,),
                in_specs=in_specs,
                out_specs=[pl.BlockSpec((Bt, C_out, L), lambda i: (i, 0, 0)),
                           pl.BlockSpec((Bt, C_out, L), lambda i: (i, 0, 0))],
            ),
            compiler_params=pltpu.CompilerParams(
                dimension_semantics=("parallel",),
                vmem_limit_bytes=vmem_limit),
        )(*operands)

    try:
        # grid-invariant weights/biases single-buffered -> VMEM freed for Bt
        return _run(pl.Buffered(1))
    except Exception:
        # TODO(synk): fallback if this Pallas build rejects pipeline_mode on
        # pallas_call in_specs; constants are then (wastefully) double-buffered.
        return _run(None)


def _reference_forward(x_ncl, params, *, kernel_size, dilation, padding,
                       compute_dtype=jnp.float32):
    """Plain-JAX reference using the SAME matmul-operand dtype as the kernel."""
    K, d, p = kernel_size, dilation, padding

    def wn(v, g):
        norm = jnp.sqrt(jnp.sum(v * v, axis=(1, 2), keepdims=True))
        return (g[:, None, None] / norm) * v

    def causal_conv(x, w, b):            # x: (N, C, L) f32, w: (C_out, C, K) f32
        L = x.shape[-1]
        xp = jnp.pad(x, ((0, 0), (0, 0), (p, 0))).astype(compute_dtype)
        wc = w.astype(compute_dtype)
        y = sum(jnp.einsum("ncl,oc->nol", xp[:, :, k * d:k * d + L], wc[:, :, k],
                           preferred_element_type=jnp.float32)
                for k in range(K))
        return y + b[None, :, None]

    w1 = wn(params["conv1_v"], params["conv1_g"])
    w2 = wn(params["conv2_v"], params["conv2_g"])
    h1 = jax.nn.relu(causal_conv(x_ncl, w1, params["conv1_b"]))
    out = jax.nn.relu(causal_conv(h1, w2, params["conv2_b"]))
    C_in, C_out = x_ncl.shape[1], w1.shape[0]
    if C_in != C_out:
        res = jnp.einsum("ncl,oc->nol",
                         x_ncl.astype(compute_dtype),
                         params["down_w"][:, :, 0].astype(compute_dtype),
                         preferred_element_type=jnp.float32) \
              + params["down_b"][None, :, None]
    else:
        res = x_ncl
    return out, jax.nn.relu(out + res)


if __name__ == "__main__":
    def run_case(name, N, C_in, C_out, L, K, dilation, key):
        stride, padding = 1, (K - 1) * dilation
        ks = jax.random.split(key, 9)
        params = {
            "conv1_v": 0.5 * jax.random.normal(ks[0], (C_out, C_in, K), jnp.float32),
            "conv1_g": 1.0 + 0.1 * jax.random.normal(ks[1], (C_out,), jnp.float32),
            "conv1_b": 0.1 * jax.random.normal(ks[2], (C_out,), jnp.float32),
            "conv2_v": 0.5 * jax.random.normal(ks[3], (C_out, C_out, K), jnp.float32),
            "conv2_g": 1.0 + 0.1 * jax.random.normal(ks[4], (C_out,), jnp.float32),
            "conv2_b": 0.1 * jax.random.normal(ks[5], (C_out,), jnp.float32),
        }
        if C_in != C_out:
            params["down_w"] = 0.5 * jax.random.normal(ks[6], (C_out, C_in, 1), jnp.float32)
            params["down_b"] = 0.1 * jax.random.normal(ks[7], (C_out,), jnp.float32)
        x = jax.random.normal(ks[8], (N, C_in, L), jnp.float32)

        out, act = temporal_block_forward(
            x, params, kernel_size=K, stride=stride, dilation=dilation,
            padding=padding, compute_dtype=jnp.bfloat16)
        out, act = jax.block_until_ready((out, act))

        ref_out, ref_act = _reference_forward(
            x, params, kernel_size=K, dilation=dilation, padding=padding,
            compute_dtype=jnp.bfloat16)
        assert out.shape == (N, C_out, L) and act.shape == (N, C_out, L), name
        assert jnp.allclose(out, ref_out, atol=2e-2, rtol=2e-2), name
        assert jnp.allclose(act, ref_act, atol=2e-2, rtol=2e-2), name

    key = jax.random.PRNGKey(0)
    k1, k2, k3 = jax.random.split(key, 3)
    # 1) C_in != C_out  -> 1x1 downsample matmul on the residual path
    run_case("downsample", N=2, C_in=4, C_out=8, L=16, K=3, dilation=2, key=k1)
    # 2) C_in == C_out  -> identity residual (no downsample matmul in the kernel)
    run_case("identity_res", N=2, C_in=8, C_out=8, L=16, K=2, dilation=1, key=k2)
    # 3) lane-dense L and a wider dilation (exercises the aligned pad block)
    run_case("lane_dense", N=4, C_in=16, C_out=32, L=128, K=3, dilation=4, key=k3)

    print("KERNEL_OK")
</pallas_src>

<mosaic_0001>
module attributes {stable_mosaic.version = 11 : i64} {
  func.func @kernel(%arg0: i32, %arg1: memref<2x4x16xf32, #tpu.memory_space<vmem>>, %arg2: memref<8x12xbf16, #tpu.memory_space<vmem>>, %arg3: memref<8x1xf32, #tpu.memory_space<vmem>>, %arg4: memref<8x24xbf16, #tpu.memory_space<vmem>>, %arg5: memref<8x1xf32, #tpu.memory_space<vmem>>, %arg6: memref<8x4xbf16, #tpu.memory_space<vmem>>, %arg7: memref<8x1xf32, #tpu.memory_space<vmem>>, %arg8: memref<2x8x16xf32, #tpu.memory_space<vmem>>, %arg9: memref<2x8x16xf32, #tpu.memory_space<vmem>>) attributes {dimension_semantics = [#tpu.dimension_semantics<parallel>], iteration_bounds = array<i64: 1>, scalar_prefetch = 0 : i64, scratch_operands = 0 : i64, tpu.core_type = #tpu.core_type<tc>, window_params = [{transform_indices = @transform_0, window_bounds = array<i64: 2, 4, 16>}, {pipeline_mode = #tpu.pipeline_mode<synchronous>, transform_indices = @transform_1, window_bounds = array<i64: 8, 12>}, {pipeline_mode = #tpu.pipeline_mode<synchronous>, transform_indices = @transform_2, window_bounds = array<i64: 8, 1>}, {pipeline_mode = #tpu.pipeline_mode<synchronous>, transform_indices = @transform_3, window_bounds = array<i64: 8, 24>}, {pipeline_mode = #tpu.pipeline_mode<synchronous>, transform_indices = @transform_4, window_bounds = array<i64: 8, 1>}, {pipeline_mode = #tpu.pipeline_mode<synchronous>, transform_indices = @transform_5, window_bounds = array<i64: 8, 4>}, {pipeline_mode = #tpu.pipeline_mode<synchronous>, transform_indices = @transform_6, window_bounds = array<i64: 8, 1>}, {transform_indices = @transform_7, window_bounds = array<i64: 2, 8, 16>}, {transform_indices = @transform_8, window_bounds = array<i64: 2, 8, 16>}]} {
    %c0 = arith.constant 0 : index
    %c0_0 = arith.constant 0 : index
    %0 = vector.load %arg2[%c0, %c0_0] : memref<8x12xbf16, #tpu.memory_space<vmem>>, vector<8x12xbf16>
    %c0_1 = arith.constant 0 : index
    %c0_2 = arith.constant 0 : index
    %1 = vector.load %arg4[%c0_1, %c0_2] : memref<8x24xbf16, #tpu.memory_space<vmem>>, vector<8x24xbf16>
    %c0_3 = arith.constant 0 : index
    %c0_4 = arith.constant 0 : index
    %2 = vector.load %arg3[%c0_3, %c0_4] : memref<8x1xf32, #tpu.memory_space<vmem>>, vector<8x1xf32>
    %c0_5 = arith.constant 0 : index
    %c0_6 = arith.constant 0 : index
    %3 = vector.load %arg5[%c0_5, %c0_6] : memref<8x1xf32, #tpu.memory_space<vmem>>, vector<8x1xf32>
    %c0_7 = arith.constant 0 : index
    %c0_8 = arith.constant 0 : index
    %c0_9 = arith.constant 0 : index
    %4 = vector.load %arg1[%c0_7, %c0_8, %c0_9] : memref<2x4x16xf32, #tpu.memory_space<vmem>>, vector<1x4x16xf32>
    %5 = vector.shape_cast %4 : vector<1x4x16xf32> to vector<4x16xf32>
    %6 = arith.truncf %5 : vector<4x16xf32> to vector<4x16xbf16>
    %cst = arith.constant 0.000000e+00 : bf16
    %7 = vector.broadcast %cst : bf16 to vector<4x128xbf16>
    %8 = tpu.concatenate %7, %6 in 1 : vector<4x128xbf16>, vector<4x16xbf16> -> vector<4x144xbf16>
    %9 = vector.extract_strided_slice %8 {offsets = [0, 124], sizes = [4, 16], strides = [1, 1]} : vector<4x144xbf16> to vector<4x16xbf16>
    %10 = vector.extract_strided_slice %8 {offsets = [0, 126], sizes = [4, 16], strides = [1, 1]} : vector<4x144xbf16> to vector<4x16xbf16>
    %11 = vector.extract_strided_slice %8 {offsets = [0, 128], sizes = [4, 16], strides = [1, 1]} : vector<4x144xbf16> to vector<4x16xbf16>
    %12 = tpu.concatenate %9, %10, %11 in 0 : vector<4x16xbf16>, vector<4x16xbf16>, vector<4x16xbf16> -> vector<12x16xbf16>
    %cst_10 = arith.constant dense<0.000000e+00> : vector<8x16xf32>
    %13 = tpu.matmul %0, %12, %cst_10 {dimension_numbers = #tpu.dot_dimension_numbers<[1], [0], [0], [1], [0, 0, 1, 1], [], []>} : vector<8x12xbf16>, vector<12x16xbf16>, vector<8x16xf32> -> vector<8x16xf32>
    %14 = vector.broadcast %2 : vector<8x1xf32> to vector<8x16xf32>
    %15 = arith.addf %13, %14 : vector<8x16xf32>
    %cst_11 = arith.constant 0.000000e+00 : f32
    %16 = vector.broadcast %cst_11 : f32 to vector<8x16xf32>
    %17 = arith.maximumf %15, %16 : vector<8x16xf32>
    %18 = arith.truncf %17 : vector<8x16xf32> to vector<8x16xbf16>
    %cst_12 = arith.constant 0.000000e+00 : bf16
    %19 = vector.broadcast %cst_12 : bf16 to vector<8x128xbf16>
    %20 = tpu.concatenate %19, %18 in 1 : vector<8x128xbf16>, vector<8x16xbf16> -> vector<8x144xbf16>
    %21 = vector.extract_strided_slice %20 {offsets = [0, 124], sizes = [8, 16], strides = [1, 1]} : vector<8x144xbf16> to vector<8x16xbf16>
    %22 = vector.extract_strided_slice %20 {offsets = [0, 126], sizes = [8, 16], strides = [1, 1]} : vector<8x144xbf16> to vector<8x16xbf16>
    %23 = vector.extract_strided_slice %20 {offsets = [0, 128], sizes = [8, 16], strides = [1, 1]} : vector<8x144xbf16> to vector<8x16xbf16>
    %24 = tpu.concatenate %21, %22, %23 in 0 : vector<8x16xbf16>, vector<8x16xbf16>, vector<8x16xbf16> -> vector<24x16xbf16>
    %cst_13 = arith.constant dense<0.000000e+00> : vector<8x16xf32>
    %25 = tpu.matmul %1, %24, %cst_13 {dimension_numbers = #tpu.dot_dimension_numbers<[1], [0], [0], [1], [0, 0, 1, 1], [], []>} : vector<8x24xbf16>, vector<24x16xbf16>, vector<8x16xf32> -> vector<8x16xf32>
    %26 = vector.broadcast %3 : vector<8x1xf32> to vector<8x16xf32>
    %27 = arith.addf %25, %26 : vector<8x16xf32>
    %cst_14 = arith.constant 0.000000e+00 : f32
    %28 = vector.broadcast %cst_14 : f32 to vector<8x16xf32>
    %29 = arith.maximumf %27, %28 : vector<8x16xf32>
    %c0_15 = arith.constant 0 : index
    %c0_16 = arith.constant 0 : index
    %30 = vector.load %arg6[%c0_15, %c0_16] : memref<8x4xbf16, #tpu.memory_space<vmem>>, vector<8x4xbf16>
    %cst_17 = arith.constant dense<0.000000e+00> : vector<8x16xf32>
    %31 = tpu.matmul %30, %6, %cst_17 {dimension_numbers = #tpu.dot_dimension_numbers<[1], [0], [0], [1], [0, 0, 1, 1], [], []>} : vector<8x4xbf16>, vector<4x16xbf16>, vector<8x16xf32> -> vector<8x16xf32>
    %c0_18 = arith.constant 0 : index
    %c0_19 = arith.constant 0 : index
    %32 = vector.load %arg7[%c0_18, %c0_19] : memref<8x1xf32, #tpu.memory_space<vmem>>, vector<8x1xf32>
    %33 = vector.broadcast %32 : vector<8x1xf32> to vector<8x16xf32>
    %34 = arith.addf %31, %33 : vector<8x16xf32>
    %c0_20 = arith.constant 0 : index
    %c0_21 = arith.constant 0 : index
    %c0_22 = arith.constant 0 : index
    %35 = vector.load %arg8[%c0_20, %c0_21, %c0_22] : memref<2x8x16xf32, #tpu.memory_space<vmem>>, vector<1x8x16xf32>
    %36 = vector.shape_cast %35 : vector<1x8x16xf32> to vector<8x16xf32>
    %37 = vector.shape_cast %29 : vector<8x16xf32> to vector<1x8x16xf32>
    tpu.vector_store %arg8[%c0_20, %c0_21, %c0_22], %37 {strides = array<i32>} : memref<2x8x16xf32, #tpu.memory_space<vmem>>, vector<1x8x16xf32>,
    %38 = arith.addf %29, %34 : vector<8x16xf32>
    %cst_23 = arith.constant 0.000000e+00 : f32
    %39 = vector.broadcast %cst_23 : f32 to vector<8x16xf32>
    %40 = arith.maximumf %38, %39 : vector<8x16xf32>
    %c0_24 = arith.constant 0 : index
    %c0_25 = arith.constant 0 : index
    %c0_26 = arith.constant 0 : index
    %41 = vector.load %arg9[%c0_24, %c0_25, %c0_26] : memref<2x8x16xf32, #tpu.memory_space<vmem>>, vector<1x8x16xf32>
    %42 = vector.shape_cast %41 : vector<1x8x16xf32> to vector<8x16xf32>
    %43 = vector.shape_cast %40 : vector<8x16xf32> to vector<1x8x16xf32>
    tpu.vector_store %arg9[%c0_24, %c0_25, %c0_26], %43 {strides = array<i32>} : memref<2x8x16xf32, #tpu.memory_space<vmem>>, vector<1x8x16xf32>,
    %c1 = arith.constant 1 : index
    %c0_27 = arith.constant 0 : index
    %c0_28 = arith.constant 0 : index
    %44 = vector.load %arg1[%c1, %c0_27, %c0_28] : memref<2x4x16xf32, #tpu.memory_space<vmem>>, vector<1x4x16xf32>
    %45 = vector.shape_cast %44 : vector<1x4x16xf32> to vector<4x16xf32>
    %46 = arith.truncf %45 : vector<4x16xf32> to vector<4x16xbf16>
    %cst_29 = arith.constant 0.000000e+00 : bf16
    %47 = vector.broadcast %cst_29 : bf16 to vector<4x128xbf16>
    %48 = tpu.concatenate %47, %46 in 1 : vector<4x128xbf16>, vector<4x16xbf16> -> vector<4x144xbf16>
    %49 = vector.extract_strided_slice %48 {offsets = [0, 124], sizes = [4, 16], strides = [1, 1]} : vector<4x144xbf16> to vector<4x16xbf16>
    %50 = vector.extract_strided_slice %48 {offsets = [0, 126], sizes = [4, 16], strides = [1, 1]} : vector<4x144xbf16> to vector<4x16xbf16>
    %51 = vector.extract_strided_slice %48 {offsets = [0, 128], sizes = [4, 16], strides = [1, 1]} : vector<4x144xbf16> to vector<4x16xbf16>
    %52 = tpu.concatenate %49, %50, %51 in 0 : vector<4x16xbf16>, vector<4x16xbf16>, vector<4x16xbf16> -> vector<12x16xbf16>
    %cst_30 = arith.constant dense<0.000000e+00> : vector<8x16xf32>
    %53 = tpu.matmul %0, %52, %cst_30 {dimension_numbers = #tpu.dot_dimension_numbers<[1], [0], [0], [1], [0, 0, 1, 1], [], []>} : vector<8x12xbf16>, vector<12x16xbf16>, vector<8x16xf32> -> vector<8x16xf32>
    %54 = vector.broadcast %2 : vector<8x1xf32> to vector<8x16xf32>
    %55 = arith.addf %53, %54 : vector<8x16xf32>
    %cst_31 = arith.constant 0.000000e+00 : f32
    %56 = vector.broadcast %cst_31 : f32 to vector<8x16xf32>
    %57 = arith.maximumf %55, %56 : vector<8x16xf32>
    %58 = arith.truncf %57 : vector<8x16xf32> to vector<8x16xbf16>
    %cst_32 = arith.constant 0.000000e+00 : bf16
    %59 = vector.broadcast %cst_32 : bf16 to vector<8x128xbf16>
    %60 = tpu.concatenate %59, %58 in 1 : vector<8x128xbf16>, vector<8x16xbf16> -> vector<8x144xbf16>
    %61 = vector.extract_strided_slice %60 {offsets = [0, 124], sizes = [8, 16], strides = [1, 1]} : vector<8x144xbf16> to vector<8x16xbf16>
    %62 = vector.extract_strided_slice %60 {offsets = [0, 126], sizes = [8, 16], strides = [1, 1]} : vector<8x144xbf16> to vector<8x16xbf16>
    %63 = vector.extract_strided_slice %60 {offsets = [0, 128], sizes = [8, 16], strides = [1, 1]} : vector<8x144xbf16> to vector<8x16xbf16>
    %64 = tpu.concatenate %61, %62, %63 in 0 : vector<8x16xbf16>, vector<8x16xbf16>, vector<8x16xbf16> -> vector<24x16xbf16>
    %cst_33 = arith.constant dense<0.000000e+00> : vector<8x16xf32>
    %65 = tpu.matmul %1, %64, %cst_33 {dimension_numbers = #tpu.dot_dimension_numbers<[1], [0], [0], [1], [0, 0, 1, 1], [], []>} : vector<8x24xbf16>, vector<24x16xbf16>, vector<8x16xf32> -> vector<8x16xf32>
    %66 = vector.broadcast %3 : vector<8x1xf32> to vector<8x16xf32>
    %67 = arith.addf %65, %66 : vector<8x16xf32>
    %cst_34 = arith.constant 0.000000e+00 : f32
    %68 = vector.broadcast %cst_34 : f32 to vector<8x16xf32>
    %69 = arith.maximumf %67, %68 : vector<8x16xf32>
    %c0_35 = arith.constant 0 : index
    %c0_36 = arith.constant 0 : index
    %70 = vector.load %arg6[%c0_35, %c0_36] : memref<8x4xbf16, #tpu.memory_space<vmem>>, vector<8x4xbf16>
    %cst_37 = arith.constant dense<0.000000e+00> : vector<8x16xf32>
    %71 = tpu.matmul %70, %46, %cst_37 {dimension_numbers = #tpu.dot_dimension_numbers<[1], [0], [0], [1], [0, 0, 1, 1], [], []>} : vector<8x4xbf16>, vector<4x16xbf16>, vector<8x16xf32> -> vector<8x16xf32>
    %c0_38 = arith.constant 0 : index
    %c0_39 = arith.constant 0 : index
    %72 = vector.load %arg7[%c0_38, %c0_39] : memref<8x1xf32, #tpu.memory_space<vmem>>, vector<8x1xf32>
    %73 = vector.broadcast %72 : vector<8x1xf32> to vector<8x16xf32>
    %74 = arith.addf %71, %73 : vector<8x16xf32>
    %c1_40 = arith.constant 1 : index
    %c0_41 = arith.constant 0 : index
    %c0_42 = arith.constant 0 : index
    %75 = vector.load %arg8[%c1_40, %c0_41, %c0_42] : memref<2x8x16xf32, #tpu.memory_space<vmem>>, vector<1x8x16xf32>
    %76 = vector.shape_cast %75 : vector<1x8x16xf32> to vector<8x16xf32>
    %77 = vector.shape_cast %69 : vector<8x16xf32> to vector<1x8x16xf32>
    tpu.vector_store %arg8[%c1_40, %c0_41, %c0_42], %77 {strides = array<i32>} : memref<2x8x16xf32, #tpu.memory_space<vmem>>, vector<1x8x16xf32>,
    %78 = arith.addf %69, %74 : vector<8x16xf32>
    %cst_43 = arith.constant 0.000000e+00 : f32
    %79 = vector.broadcast %cst_43 : f32 to vector<8x16xf32>
    %80 = arith.maximumf %78, %79 : vector<8x16xf32>
    %c1_44 = arith.constant 1 : index
    %c0_45 = arith.constant 0 : index
    %c0_46 = arith.constant 0 : index
    %81 = vector.load %arg9[%c1_44, %c0_45, %c0_46] : memref<2x8x16xf32, #tpu.memory_space<vmem>>, vector<1x8x16xf32>
    %82 = vector.shape_cast %81 : vector<1x8x16xf32> to vector<8x16xf32>
    %83 = vector.shape_cast %80 : vector<8x16xf32> to vector<1x8x16xf32>
    tpu.vector_store %arg9[%c1_44, %c0_45, %c0_46], %83 {strides = array<i32>} : memref<2x8x16xf32, #tpu.memory_space<vmem>>, vector<1x8x16xf32>,
    return
  }
  func.func @transform_0(%arg0: i32) -> (i32, i32, i32) {
    %c0_i32 = arith.constant 0 : i32
    %c0_i32_0 = arith.constant 0 : i32
    %c0_i32_1 = arith.constant 0 : i32
    return %arg0, %c0_i32, %c0_i32_0 : i32, i32, i32
  }
  func.func @transform_1(%arg0: i32) -> (i32, i32) {
    %c0_i32 = arith.constant 0 : i32
    %c0_i32_0 = arith.constant 0 : i32
    %c0_i32_1 = arith.constant 0 : i32
    return %c0_i32, %c0_i32_0 : i32, i32
  }
  func.func @transform_2(%arg0: i32) -> (i32, i32) {
    %c0_i32 = arith.constant 0 : i32
    %c0_i32_0 = arith.constant 0 : i32
    %c0_i32_1 = arith.constant 0 : i32
    return %c0_i32, %c0_i32_0 : i32, i32
  }
  func.func @transform_3(%arg0: i32) -> (i32, i32) {
    %c0_i32 = arith.constant 0 : i32
    %c0_i32_0 = arith.constant 0 : i32
    %c0_i32_1 = arith.constant 0 : i32
    return %c0_i32, %c0_i32_0 : i32, i32
  }
  func.func @transform_4(%arg0: i32) -> (i32, i32) {
    %c0_i32 = arith.constant 0 : i32
    %c0_i32_0 = arith.constant 0 : i32
    %c0_i32_1 = arith.constant 0 : i32
    return %c0_i32, %c0_i32_0 : i32, i32
  }
  func.func @transform_5(%arg0: i32) -> (i32, i32) {
    %c0_i32 = arith.constant 0 : i32
    %c0_i32_0 = arith.constant 0 : i32
    %c0_i32_1 = arith.constant 0 : i32
    return %c0_i32, %c0_i32_0 : i32, i32
  }
  func.func @transform_6(%arg0: i32) -> (i32, i32) {
    %c0_i32 = arith.constant 0 : i32
    %c0_i32_0 = arith.constant 0 : i32
    %c0_i32_1 = arith.constant 0 : i32
    return %c0_i32, %c0_i32_0 : i32, i32
  }
  func.func @transform_7(%arg0: i32) -> (i32, i32, i32) {
    %c0_i32 = arith.constant 0 : i32
    %c0_i32_0 = arith.constant 0 : i32
    %c0_i32_1 = arith.constant 0 : i32
    return %arg0, %c0_i32, %c0_i32_0 : i32, i32, i32
  }
  func.func @transform_8(%arg0: i32) -> (i32, i32, i32) {
    %c0_i32 = arith.constant 0 : i32
    %c0_i32_0 = arith.constant 0 : i32
    %c0_i32_1 = arith.constant 0 : i32
    return %arg0, %c0_i32, %c0_i32_0 : i32, i32, i32
  }
}

module attributes {stable_mosaic.version = 11 : i64} {
  func.func @kernel(%arg0: i32, %arg1: memref<2x4x16xf32, #tpu.memory_space<vmem>>, %arg2: memref<8x12xbf16, #tpu.memory_space<vmem>>, %arg3: memref<8x1xf32, #tpu.memory_space<vmem>>, %arg4: memref<8x24xbf16, #tpu.memory_space<vmem>>, %arg5: memref<8x1xf32, #tpu.memory_space<vmem>>, %arg6: memref<8x4xbf16, #tpu.memory_space<vmem>>, %arg7: memref<8x1xf32, #tpu.memory_space<vmem>>, %arg8: memref<2x8x16xf32, #tpu.memory_space<vmem>>, %arg9: memref<2x8x16xf32, #tpu.memory_space<vmem>>) attributes {dimension_semantics = [#tpu.dimension_semantics<parallel>], iteration_bounds = array<i64: 1>, scalar_prefetch = 0 : i64, scratch_operands = 0 : i64, tpu.core_type = #tpu.core_type<tc>, window_params = [{transform_indices = @transform_0, window_bounds = array<i64: 2, 4, 16>}, {pipeline_mode = #tpu.pipeline_mode<synchronous>, transform_indices = @transform_1, window_bounds = array<i64: 8, 12>}, {pipeline_mode = #tpu.pipeline_mode<synchronous>, transform_indices = @transform_2, window_bounds = array<i64: 8, 1>}, {pipeline_mode = #tpu.pipeline_mode<synchronous>, transform_indices = @transform_3, window_bounds = array<i64: 8, 24>}, {pipeline_mode = #tpu.pipeline_mode<synchronous>, transform_indices = @transform_4, window_bounds = array<i64: 8, 1>}, {pipeline_mode = #tpu.pipeline_mode<synchronous>, transform_indices = @transform_5, window_bounds = array<i64: 8, 4>}, {pipeline_mode = #tpu.pipeline_mode<synchronous>, transform_indices = @transform_6, window_bounds = array<i64: 8, 1>}, {transform_indices = @transform_7, window_bounds = array<i64: 2, 8, 16>}, {transform_indices = @transform_8, window_bounds = array<i64: 2, 8, 16>}]} {
    %c0 = arith.constant 0 : index
    %c0_0 = arith.constant 0 : index
    %0 = vector.load %arg2[%c0, %c0_0] : memref<8x12xbf16, #tpu.memory_space<vmem>>, vector<8x12xbf16>
    %c0_1 = arith.constant 0 : index
    %c0_2 = arith.constant 0 : index
    %1 = vector.load %arg4[%c0_1, %c0_2] : memref<8x24xbf16, #tpu.memory_space<vmem>>, vector<8x24xbf16>
    %c0_3 = arith.constant 0 : index
    %c0_4 = arith.constant 0 : index
    %2 = vector.load %arg3[%c0_3, %c0_4] : memref<8x1xf32, #tpu.memory_space<vmem>>, vector<8x1xf32>
    %c0_5 = arith.constant 0 : index
    %c0_6 = arith.constant 0 : index
    %3 = vector.load %arg5[%c0_5, %c0_6] : memref<8x1xf32, #tpu.memory_space<vmem>>, vector<8x1xf32>
    %c0_7 = arith.constant 0 : index
    %c0_8 = arith.constant 0 : index
    %c0_9 = arith.constant 0 : index
    %4 = vector.load %arg1[%c0_7, %c0_8, %c0_9] : memref<2x4x16xf32, #tpu.memory_space<vmem>>, vector<1x4x16xf32>
    %5 = vector.shape_cast %4 : vector<1x4x16xf32> to vector<4x16xf32>
    %6 = arith.truncf %5 : vector<4x16xf32> to vector<4x16xbf16>
    %cst = arith.constant 0.000000e+00 : bf16
    %7 = vector.broadcast %cst : bf16 to vector<4x128xbf16>
    %8 = tpu.concatenate %7, %6 in 1 : vector<4x128xbf16>, vector<4x16xbf16> -> vector<4x144xbf16>
    %9 = vector.extract_strided_slice %8 {offsets = [0, 124], sizes = [4, 16], strides = [1, 1]} : vector<4x144xbf16> to vector<4x16xbf16>
    %10 = vector.extract_strided_slice %8 {offsets = [0, 126], sizes = [4, 16], strides = [1, 1]} : vector<4x144xbf16> to vector<4x16xbf16>
    %11 = vector.extract_strided_slice %8 {offsets = [0, 128], sizes = [4, 16], strides = [1, 1]} : vector<4x144xbf16> to vector<4x16xbf16>
    %12 = tpu.concatenate %9, %10, %11 in 0 : vector<4x16xbf16>, vector<4x16xbf16>, vector<4x16xbf16> -> vector<12x16xbf16>
    %cst_10 = arith.constant dense<0.000000e+00> : vector<8x16xf32>
    %13 = tpu.matmul %0, %12, %cst_10 {dimension_numbers = #tpu.dot_dimension_numbers<[1], [0], [0], [1], [0, 0, 1, 1], [], []>} : vector<8x12xbf16>, vector<12x16xbf16>, vector<8x16xf32> -> vector<8x16xf32>
    %14 = vector.broadcast %2 : vector<8x1xf32> to vector<8x16xf32>
    %15 = arith.addf %13, %14 : vector<8x16xf32>
    %cst_11 = arith.constant 0.000000e+00 : f32
    %16 = vector.broadcast %cst_11 : f32 to vector<8x16xf32>
    %17 = arith.maximumf %15, %16 : vector<8x16xf32>
    %18 = arith.truncf %17 : vector<8x16xf32> to vector<8x16xbf16>
    %cst_12 = arith.constant 0.000000e+00 : bf16
    %19 = vector.broadcast %cst_12 : bf16 to vector<8x128xbf16>
    %20 = tpu.concatenate %19, %18 in 1 : vector<8x128xbf16>, vector<8x16xbf16> -> vector<8x144xbf16>
    %21 = vector.extract_strided_slice %20 {offsets = [0, 124], sizes = [8, 16], strides = [1, 1]} : vector<8x144xbf16> to vector<8x16xbf16>
    %22 = vector.extract_strided_slice %20 {offsets = [0, 126], sizes = [8, 16], strides = [1, 1]} : vector<8x144xbf16> to vector<8x16xbf16>
    %23 = vector.extract_strided_slice %20 {offsets = [0, 128], sizes = [8, 16], strides = [1, 1]} : vector<8x144xbf16> to vector<8x16xbf16>
    %24 = tpu.concatenate %21, %22, %23 in 0 : vector<8x16xbf16>, vector<8x16xbf16>, vector<8x16xbf16> -> vector<24x16xbf16>
    %cst_13 = arith.constant dense<0.000000e+00> : vector<8x16xf32>
    %25 = tpu.matmul %1, %24, %cst_13 {dimension_numbers = #tpu.dot_dimension_numbers<[1], [0], [0], [1], [0, 0, 1, 1], [], []>} : vector<8x24xbf16>, vector<24x16xbf16>, vector<8x16xf32> -> vector<8x16xf32>
    %26 = vector.broadcast %3 : vector<8x1xf32> to vector<8x16xf32>
    %27 = arith.addf %25, %26 : vector<8x16xf32>
    %cst_14 = arith.constant 0.000000e+00 : f32
    %28 = vector.broadcast %cst_14 : f32 to vector<8x16xf32>
    %29 = arith.maximumf %27, %28 : vector<8x16xf32>
    %c0_15 = arith.constant 0 : index
    %c0_16 = arith.constant 0 : index
    %30 = vector.load %arg6[%c0_15, %c0_16] : memref<8x4xbf16, #tpu.memory_space<vmem>>, vector<8x4xbf16>
    %cst_17 = arith.constant dense<0.000000e+00> : vector<8x16xf32>
    %31 = tpu.matmul %30, %6, %cst_17 {dimension_numbers = #tpu.dot_dimension_numbers<[1], [0], [0], [1], [0, 0, 1, 1], [], []>} : vector<8x4xbf16>, vector<4x16xbf16>, vector<8x16xf32> -> vector<8x16xf32>
    %c0_18 = arith.constant 0 : index
    %c0_19 = arith.constant 0 : index
    %32 = vector.load %arg7[%c0_18, %c0_19] : memref<8x1xf32, #tpu.memory_space<vmem>>, vector<8x1xf32>
    %33 = vector.broadcast %32 : vector<8x1xf32> to vector<8x16xf32>
    %34 = arith.addf %31, %33 : vector<8x16xf32>
    %c0_20 = arith.constant 0 : index
    %c0_21 = arith.constant 0 : index
    %c0_22 = arith.constant 0 : index
    %35 = vector.load %arg8[%c0_20, %c0_21, %c0_22] : memref<2x8x16xf32, #tpu.memory_space<vmem>>, vector<1x8x16xf32>
    %36 = vector.shape_cast %35 : vector<1x8x16xf32> to vector<8x16xf32>
    %37 = vector.shape_cast %29 : vector<8x16xf32> to vector<1x8x16xf32>
    tpu.vector_store %arg8[%c0_20, %c0_21, %c0_22], %37 {strides = array<i32>} : memref<2x8x16xf32, #tpu.memory_space<vmem>>, vector<1x8x16xf32>,
    %38 = arith.addf %29, %34 : vector<8x16xf32>
    %cst_23 = arith.constant 0.000000e+00 : f32
    %39 = vector.broadcast %cst_23 : f32 to vector<8x16xf32>
    %40 = arith.maximumf %38, %39 : vector<8x16xf32>
    %c0_24 = arith.constant 0 : index
    %c0_25 = arith.constant 0 : index
    %c0_26 = arith.constant 0 : index
    %41 = vector.load %arg9[%c0_24, %c0_25, %c0_26] : memref<2x8x16xf32, #tpu.memory_space<vmem>>, vector<1x8x16xf32>
    %42 = vector.shape_cast %41 : vector<1x8x16xf32> to vector<8x16xf32>
    %43 = vector.shape_cast %40 : vector<8x16xf32> to vector<1x8x16xf32>
    tpu.vector_store %arg9[%c0_24, %c0_25, %c0_26], %43 {strides = array<i32>} : memref<2x8x16xf32, #tpu.memory_space<vmem>>, vector<1x8x16xf32>,
    %c1 = arith.constant 1 : index
    %c0_27 = arith.constant 0 : index
    %c0_28 = arith.constant 0 : index
    %44 = vector.load %arg1[%c1, %c0_27, %c0_28] : memref<2x4x16xf32, #tpu.memory_space<vmem>>, vector<1x4x16xf32>
    %45 = vector.shape_cast %44 : vector<1x4x16xf32> to vector<4x16xf32>
    %46 = arith.truncf %45 : vector<4x16xf32> to vector<4x16xbf16>
    %cst_29 = arith.constant 0.000000e+00 : bf16
    %47 = vector.broadcast %cst_29 : bf16 to vector<4x128xbf16>
    %48 = tpu.concatenate %47, %46 in 1 : vector<4x128xbf16>, vector<4x16xbf16> -> vector<4x144xbf16>
    %49 = vector.extract_strided_slice %48 {offsets = [0, 124], sizes = [4, 16], strides = [1, 1]} : vector<4x144xbf16> to vector<4x16xbf16>
    %50 = vector.extract_strided_slice %48 {offsets = [0, 126], sizes = [4, 16], strides = [1, 1]} : vector<4x144xbf16> to vector<4x16xbf16>
    %51 = vector.extract_strided_slice %48 {offsets = [0, 128], sizes = [4, 16], strides = [1, 1]} : vector<4x144xbf16> to vector<4x16xbf16>
    %52 = tpu.concatenate %49, %50, %51 in 0 : vector<4x16xbf16>, vector<4x16xbf16>, vector<4x16xbf16> -> vector<12x16xbf16>
    %cst_30 = arith.constant dense<0.000000e+00> : vector<8x16xf32>
    %53 = tpu.matmul %0, %52, %cst_30 {dimension_numbers = #tpu.dot_dimension_numbers<[1], [0], [0], [1], [0, 0, 1, 1], [], []>} : vector<8x12xbf16>, vector<12x16xbf16>, vector<8x16xf32> -> vector<8x16xf32>
    %54 = vector.broadcast %2 : vector<8x1xf32> to vector<8x16xf32>
    %55 = arith.addf %53, %54 : vector<8x16xf32>
    %cst_31 = arith.constant 0.000000e+00 : f32
    %56 = vector.broadcast %cst_31 : f32 to vector<8x16xf32>
    %57 = arith.maximumf %55, %56 : vector<8x16xf32>
    %58 = arith.truncf %57 : vector<8x16xf32> to vector<8x16xbf16>
    %cst_32 = arith.constant 0.000000e+00 : bf16
    %59 = vector.broadcast %cst_32 : bf16 to vector<8x128xbf16>
    %60 = tpu.concatenate %59, %58 in 1 : vector<8x128xbf16>, vector<8x16xbf16> -> vector<8x144xbf16>
    %61 = vector.extract_strided_slice %60 {offsets = [0, 124], sizes = [8, 16], strides = [1, 1]} : vector<8x144xbf16> to vector<8x16xbf16>
    %62 = vector.extract_strided_slice %60 {offsets = [0, 126], sizes = [8, 16], strides = [1, 1]} : vector<8x144xbf16> to vector<8x16xbf16>
    %63 = vector.extract_strided_slice %60 {offsets = [0, 128], sizes = [8, 16], strides = [1, 1]} : vector<8x144xbf16> to vector<8x16xbf16>
    %64 = tpu.concatenate %61, %62, %63 in 0 : vector<8x16xbf16>, vector<8x16xbf16>, vector<8x16xbf16> -> vector<24x16xbf16>
    %cst_33 = arith.constant dense<0.000000e+00> : vector<8x16xf32>
    %65 = tpu.matmul %1, %64, %cst_33 {dimension_numbers = #tpu.dot_dimension_numbers<[1], [0], [0], [1], [0, 0, 1, 1], [], []>} : vector<8x24xbf16>, vector<24x16xbf16>, vector<8x16xf32> -> vector<8x16xf32>
    %66 = vector.broadcast %3 : vector<8x1xf32> to vector<8x16xf32>
    %67 = arith.addf %65, %66 : vector<8x16xf32>
    %cst_34 = arith.constant 0.000000e+00 : f32
    %68 = vector.broadcast %cst_34 : f32 to vector<8x16xf32>
    %69 = arith.maximumf %67, %68 : vector<8x16xf32>
    %c0_35 = arith.constant 0 : index
    %c0_36 = arith.constant 0 : index
    %70 = vector.load %arg6[%c0_35, %c0_36] : memref<8x4xbf16, #tpu.memory_space<vmem>>, vector<8x4xbf16>
    %cst_37 = arith.constant dense<0.000000e+00> : vector<8x16xf32>
    %71 = tpu.matmul %70, %46, %cst_37 {dimension_numbers = #tpu.dot_dimension_numbers<[1], [0], [0], [1], [0, 0, 1, 1], [], []>} : vector<8x4xbf16>, vector<4x16xbf16>, vector<8x16xf32> -> vector<8x16xf32>
    %c0_38 = arith.constant 0 : index
    %c0_39 = arith.constant 0 : index
    %72 = vector.load %arg7[%c0_38, %c0_39] : memref<8x1xf32, #tpu.memory_space<vmem>>, vector<8x1xf32>
    %73 = vector.broadcast %72 : vector<8x1xf32> to vector<8x16xf32>
    %74 = arith.addf %71, %73 : vector<8x16xf32>
    %c1_40 = arith.constant 1 : index
    %c0_41 = arith.constant 0 : index
    %c0_42 = arith.constant 0 : index
    %75 = vector.load %arg8[%c1_40, %c0_41, %c0_42] : memref<2x8x16xf32, #tpu.memory_space<vmem>>, vector<1x8x16xf32>
    %76 = vector.shape_cast %75 : vector<1x8x16xf32> to vector<8x16xf32>
    %77 = vector.shape_cast %69 : vector<8x16xf32> to vector<1x8x16xf32>
    tpu.vector_store %arg8[%c1_40, %c0_41, %c0_42], %77 {strides = array<i32>} : memref<2x8x16xf32, #tpu.memory_space<vmem>>, vector<1x8x16xf32>,
    %78 = arith.addf %69, %74 : vector<8x16xf32>
    %cst_43 = arith.constant 0.000000e+00 : f32
    %79 = vector.broadcast %cst_43 : f32 to vector<8x16xf32>
    %80 = arith.maximumf %78, %79 : vector<8x16xf32>
    %c1_44 = arith.constant 1 : index
    %c0_45 = arith.constant 0 : index
    %c0_46 = arith.constant 0 : index
    %81 = vector.load %arg9[%c1_44, %c0_45, %c0_46] : memref<2x8x16xf32, #tpu.memory_space<vmem>>, vector<1x8x16xf32>
    %82 = vector.shape_cast %81 : vector<1x8x16xf32> to vector<8x16xf32>
    %83 = vector.shape_cast %80 : vector<8x16xf32> to vector<1x8x16xf32>
    tpu.vector_store %arg9[%c1_44, %c0_45, %c0_46], %83 {strides = array<i32>} : memref<2x8x16xf32, #tpu.memory_space<vmem>>, vector<1x8x16xf32>,
    return
  }
  func.func @transform_0(%arg0: i32) -> (i32, i32, i32) {
    %c0_i32 = arith.constant 0 : i32
    %c0_i32_0 = arith.constant 0 : i32
    %c0_i32_1 = arith.constant 0 : i32
    return %arg0, %c0_i32, %c0_i32_0 : i32, i32, i32
  }
  func.func @transform_1(%arg0: i32) -> (i32, i32) {
    %c0_i32 = arith.constant 0 : i32
    %c0_i32_0 = arith.constant 0 : i32
    %c0_i32_1 = arith.constant 0 : i32
    return %c0_i32, %c0_i32_0 : i32, i32
  }
  func.func @transform_2(%arg0: i32) -> (i32, i32) {
    %c0_i32 = arith.constant 0 : i32
    %c0_i32_0 = arith.constant 0 : i32
    %c0_i32_1 = arith.constant 0 : i32
    return %c0_i32, %c0_i32_0 : i32, i32
  }
  func.func @transform_3(%arg0: i32) -> (i32, i32) {
    %c0_i32 = arith.constant 0 : i32
    %c0_i32_0 = arith.constant 0 : i32
    %c0_i32_1 = arith.constant 0 : i32
    return %c0_i32, %c0_i32_0 : i32, i32
  }
  func.func @transform_4(%arg0: i32) -> (i32, i32) {
    %c0_i32 = arith.constant 0 : i32
    %c0_i32_0 = arith.constant 0 : i32
    %c0_i32_1 = arith.constant 0 : i32
    return %c0_i32, %c0_i32_0 : i32, i32
  }
  func.func @transform_5(%arg0: i32) -> (i32, i32) {
    %c0_i32 = arith.constant 0 : i32
    %c0_i32_0 = arith.constant 0 : i32
    %c0_i32_1 = arith.constant 0 : i32
    return %c0_i32, %c0_i32_0 : i32, i32
  }
  func.func @transform_6(%arg0: i32) -> (i32, i32) {
    %c0_i32 = arith.constant 0 : i32
    %c0_i32_0 = arith.constant 0 : i32
    %c0_i32_1 = arith.constant 0 : i32
    return %c0_i32, %c0_i32_0 : i32, i32
  }
  func.func @transform_7(%arg0: i32) -> (i32, i32, i32) {
    %c0_i32 = arith.constant 0 : i32
    %c0_i32_0 = arith.constant 0 : i32
    %c0_i32_1 = arith.constant 0 : i32
    return %arg0, %c0_i32, %c0_i32_0 : i32, i32, i32
  }
  func.func @transform_8(%arg0: i32) -> (i32, i32, i32) {
    %c0_i32 = arith.constant 0 : i32
    %c0_i32_0 = arith.constant 0 : i32
    %c0_i32_1 = arith.constant 0 : i32
    return %arg0, %c0_i32, %c0_i32_0 : i32, i32, i32
  }
}

</mosaic_0001>

<bundles_post_ra>
// kernel: tpu_custom_call.1
= control target key start
LH: loop header
LB: loop body
LE: loop exit
PB: predicated region body
PF: predicated region fallthrough
CT: control target
= control target key end

     0   :  { %14 = vsyncpa [#allocation3], 0  ;;  %v604_v1 = vmov 0   ;;  %s792_s0 = inlined_call_operand.vmem [shape: f32[2,4,16], index: 0, kind: input, shape index: {}]   ;;  %s793_s1 = inlined_call_operand.vmem [shape: bf16[8,12], index: 1, kind: input, shape index: {}]   ;;  %s794_s2 = inlined_call_operand.vmem [shape: f32[8,1], index: 2, kind: input, shape index: {}]   ;;  %s795_s3 = inlined_call_operand.vmem [shape: bf16[8,24], index: 3, kind: input, shape index: {}]   ;;  %s796_s4 = inlined_call_operand.vmem [shape: f32[8,1], index: 4, kind: input, shape index: {}]   ;;  %s797_s5 = inlined_call_operand.vmem [shape: bf16[8,4], index: 5, kind: input, shape index: {}]   ;;  %s798_s6 = inlined_call_operand.vmem [shape: f32[8,1], index: 6, kind: input, shape index: {}]   ;;  %s799_s7 = inlined_call_operand.hbm [shape: f32[2,8,16], index: 7, kind: output, shape index: {0}]   ;;  %s800_s8 = inlined_call_operand.hbm [shape: f32[2,8,16], index: 8, kind: output, shape index: {1}]  }
   0x1   :  { %v35_v0 = vld [vmem:[%s792_s0] sm:$0xf]  ;;  %v39_v2 = vrot.slane %v604_v1, 6  ;;  %558 = vset.pattern.permute.xlu1 %v604_v1  ;;  %559 = vset.pattern.permute.xlu0 %v604_v1 }
   0x2   :  { %v662_v3 = vpack.c.bf16 %v35_v0, %v35_v0 }
   0x3   :  { %15 = vsyncpa [#allocation5], 0  ;;  %s605_s29 = smov 126   ;;  %s606_s30 = smov 124   ;;  %v607_v6 = vmov 0.0   ;;  %vm608_vm0 = vmmov 0  }
   0x4   :  { %41 = vrot.lane.b32.xlu0 %v39_v2, %s605_s29  ;;  %v40_v4 = vrot.slane %v662_v3, 6  ;;  %v47_v5 = vrot.slane %v662_v3, 4  ;;  %508 = vmatprep.subr.bf16.mxu0 %v607_v6  ;;  %vm45_vm1 = vcmask 1031168   ;;  %vm50_vm2 = vcmask 1041408   ;;  %s609_s9 = smov 4   ;;  %v33_v15 = vld [vmem:[%s794_s2] sm:$0xff] }
   0x5   :  { %514 = vmatprep.subr.bf16.mxu1 %v607_v6  ;;  %510 = vmatprep.mubr.msk.bf16.mxu0 %vm608_vm0, %v607_v6  ;;  %vm57_vm3 = vcmask 1043456   ;;  %v490_v16 = vld [vmem:[%s792_s0 + $0x4] sm:$0xf]  ;;  %v125_v17 = vrot.slane %v604_v1, 4  ;;  %vm72_vm4 = vcmask 31744   ;;  %vm78_vm5 = vcmask 1045504  }
   0x6   :  { %48 = vrot.lane.b32.xlu1 %v47_v5, %s606_s30  ;;  %518 = vmatprep.mubr.msk.bf16.mxu1 %vm608_vm0, %v607_v6  ;;  %v689_v18 = vpack.c.bf16 %v490_v16, %v490_v16  ;;  %v31_v24 = vld [vmem:[%s793_s1] sm:$0xf]  ;;  %vm74_vm6 = vcmask 97280   ;;  %vm154_vm7 = vcmask 195584   ;;  %v213_v58 = vsel %vm50_vm2, %v662_v3, 0  ;;  %s611_s21 = smov [#allocation4]  }
   0x7   :  { %v733_v53 = vld [vmem:[%s795_s3] sm:$0xf]  ;;  %vm255_vm8 = vcmask 130048   ;;  %s472_s22 = sshll.u32 %s611_s21, 4  ;;  %s473_s22 = int_to_ptr.vmem [resolvable:$true] %s472_s22 }
   0x8   :  { %43 = vrot.lane.b32.xlu0 %v40_v4, %s605_s29  ;;  %v264_v19 = vrot.slane %v689_v18, 6  ;;  %v268_v34 = vrot.slane %v689_v18, 4  ;;  %v407_v59 = vsel %vm50_vm2, %v689_v18, 0  ;;  %v202_v60 = vld [vmem:[%s797_s5] sm:$0xf] }
   0x9   :  { %v397_v61 = vld [vmem:[%s797_s5] sm:$0xf] }
   0xa   :  { %v34_v16 = vld [vmem:[%s796_s4] sm:$0xff]  ;;  %s610_s4 = smov [#allocation2]  }
  0x76   :  { %v42_v7 = vpop.permute.xlu0 %41 }
  0x78   :  { %v49_v8 = vpop.permute.xlu1 %48 }
  0x7a   :  { %v44_v9 = vpop.permute.xlu0 %43 }
  0x7b   :  { %v46_v10 = vsel %vm45_vm1, %v42_v7, %v44_v9  ;;  %v56_v11 = vsel %vm50_vm2, %v662_v3, %v44_v9 }
  0x7c   :  { %v53_v12 = vsel %vm50_vm2, 0, %v46_v10  ;;  %v60_v13 = vsel %vm57_vm3, %v56_v11, %v49_v8 }
  0x7d   :  { %70 = vrot.lane.b32.xlu0 %v60_v13, %s609_s9  ;;  %v59_v14 = vsel %vm57_vm3, %v53_v12, %v49_v8 }
  0x7e   :  { %68 = vrot.lane.b32.xlu1 %v59_v14, %s609_s9 }
  0x82   :  { %63 = vperm.xlu1 %558, %v33_v15  }
  0x86   :  { %127 = vrot.lane.b32.xlu1 %v125_v17, %s605_s29  ;;  %v203_v17 = vld [vmem:[%s798_s6] sm:$0xff]  ;;  %s460_s6 = sshll.u32 %s610_s4, 4  ;;  %s461_s6 = int_to_ptr.vmem [resolvable:$true] %s460_s6 }
  0x87   :  { %s560_s23 = scalar_lea.vmem %s461_s6, 256  ;;  %p565_p1 = scmp.lt.s32.totalorder %s461_s6, %s461_s6 }
  0x88   :  { %p561_p0 = scmp.ne.s32.totalorder %s461_s6, %s560_s23  ;;  %p566_p2 = scmp.lt.s32.totalorder %s560_s23, %s560_s23 }
  0x8a   :  { %265 = vrot.lane.b32.xlu1 %v264_v19, %s605_s29  ;;  %p567_p3 = por %p566_p2, %p565_p1 }
  0x8c   :  { %p568_p4 = pnand %p567_p3, %p561_p0 }
  0xef   :  { %v71_v20 = vpop.permute.xlu0 %70 }
  0xf0   :  { %v69_v21 = vpop.permute.xlu1 %68 }
  0xf1   :  { %v73_v22 = vsel %vm72_vm4, %v69_v21, %v71_v20 }
  0xf2   :  { %v80_v23 = vsel %vm78_vm5, %v73_v22, 0 }
  0xf3   :  { %509 = vmatpush3.bf16.msra.mxu0 %v80_v23 }
  0xf4   :  { %522 = vmatprep.subr.bf16.mxu0 %v607_v6 }
  0xf6   :  { %511 = vmatmul.mubr.msk.bf16.vlgmr.msra.gmra.mxu0 %vm74_vm6, %v31_v24 }
  0xf7   :  { %524 = vmatprep.mubr.msk.bf16.mxu0 %vm608_vm0, %v607_v6  ;;  %523 = vmatpush3.bf16.msra.mxu0 %v213_v58 }
  0xf8   :  { %534 = vmatprep.subr.bf16.mxu0 %v607_v6 }
  0xfd   :  { %v703_v25 = vpop.permute.xlu1 %63 }
  0xfe   :  { %525 = vmatmul.mubr.msk.bf16.vlgmr.msra.gmra.mxu0 %vm72_vm4, %v202_v60 }
  0xff   :  { %538 = vmatprep.mubr.msk.bf16.mxu0 %vm608_vm0, %v607_v6 }
 0x101   :  { %v710_v35 = vpop.permute.xlu1 %127 }
 0x105   :  { %v266_v37 = vpop.permute.xlu1 %265 }
 0x106   :  { %v267_v39 = vsel %vm45_vm1, %v42_v7, %v266_v37  ;;  %v275_v42 = vsel %vm50_vm2, %v689_v18, %v266_v37 }
 0x107   :  { %v272_v44 = vsel %vm50_vm2, 0, %v267_v39 }
 0x1b6   :  { %v116_v26 = vpop.f32.mrf.mxu0 }
 0x1b7   :  { %v117_v27 = vadd.f32 %v116_v26, %v703_v25 }
 0x1b8   :  { %v512_v28 = vpop.f32.mrf.mxu0 }
 0x1b9   :  { %v122_v29 = vmax.f32 %v117_v27, 0.0 }
 0x1ba   :  { %v119_v30 = vpop.f32.mrf.mxu0 }
 0x1bb   :  { %v123_v31 = vpack.c.bf16 %v122_v29, %v122_v29 }
 0x1bc   :  { %v513_v32 = vpop.f32.mrf.mxu0 }
 0x1bd   :  { %132 = vrot.lane.b32.xlu0 %v123_v31, %s606_s30  ;;  %v126_v33 = vrot.slane %v123_v31, 4 }
 0x1be   :  { %v249_v18 = vpop.f32.mrf.mxu0 }
 0x1c0   :  { %v526_v20 = vpop.f32.mrf.mxu0 }
 0x1c1   :  { %129 = vrot.lane.b32.xlu0 %v126_v33, %s605_s29 }
 0x1c2   :  { %v252_v21 = vpop.f32.mrf.mxu0 }
 0x1c4   :  { %v527_v23 = vpop.f32.mrf.mxu0 }
 0x1c5   :  { %269 = vrot.lane.b32.xlu0 %v268_v34, %s606_s30 }
 0x22f   :  { %v133_v36 = vpop.permute.xlu0 %132 }
 0x230   :  { %150 = vrot.lane.b32.xlu1 %v133_v36, %s609_s9 }
 0x233   :  { %v130_v38 = vpop.permute.xlu0 %129 }
 0x234   :  { %v131_v40 = vsel %vm45_vm1, %v710_v35, %v130_v38  ;;  %v138_v41 = vsel %vm57_vm3, %v123_v31, %v130_v38 }
 0x235   :  { %148 = vrot.lane.b32.xlu1 %v138_v41, %s609_s9  ;;  %v135_v43 = vsel %vm57_vm3, 0, %v131_v40 }
 0x236   :  { %146 = vrot.lane.b32.xlu0 %v135_v43, %s609_s9 }
 0x237   :  { %v270_v45 = vpop.permute.xlu0 %269 }
 0x238   :  { %v278_v46 = vsel %vm57_vm3, %v275_v42, %v270_v45  ;;  %v277_v47 = vsel %vm57_vm3, %v272_v44, %v270_v45 }
 0x239   :  { %283 = vrot.lane.b32.xlu1 %v278_v46, %s609_s9 }
 0x23a   :  { %281 = vrot.lane.b32.xlu0 %v277_v47, %s609_s9 }
 0x2a2   :  { %v151_v48 = vpop.permute.xlu1 %150 }
 0x2a3   :  { %v159_v49 = vsel %vm57_vm3, %v151_v48, 0 }
 0x2a4   :  { %515 = vmatpush3.bf16.msra.mxu1 %v159_v49 }
 0x2a5   :  { %516 = vmatprep.subr.bf16.mxu1 %v607_v6 }
 0x2a7   :  { %v149_v50 = vpop.permute.xlu1 %148 }
 0x2a8   :  { %v147_v51 = vpop.permute.xlu0 %146 }
 0x2a9   :  { %v152_v52 = vsel %vm72_vm4, %v147_v51, %v149_v50 }
 0x2aa   :  { %517 = vmatpush3.bf16.msra.mxu1 %v152_v52 }
 0x2ab   :  { %v284_v54 = vpop.permute.xlu1 %283  ;;  %528 = vmatprep.subr.bf16.mxu1 %v607_v6 }
 0x2ac   :  { %v282_v55 = vpop.permute.xlu0 %281 }
 0x2ad   :  { %v285_v56 = vsel %vm72_vm4, %v282_v55, %v284_v54  ;;  %519 = vmatmul.mubr.msk.bf16.vlgmr.msra.gmra.mxu1 %vm154_vm7, %v733_v53 }
 0x2ae   :  { %v287_v57 = vsel %vm78_vm5, %v285_v56, 0  ;;  %530 = vmatprep.mubr.msk.bf16.mxu1 %vm608_vm0, %v607_v6 }
 0x2af   :  { %529 = vmatpush3.bf16.msra.mxu1 %v287_v57 }
 0x2b0   :  { %542 = vmatprep.subr.bf16.mxu1 %v607_v6 }
 0x2b5   :  { %531 = vmatmul.mubr.msk.bf16.vlgmr.msra.gmra.mxu1 %vm74_vm6, %v31_v24 }
 0x2b6   :  { %544 = vmatprep.mubr.msk.bf16.mxu1 %vm608_vm0, %v607_v6  ;;  %543 = vmatpush3.bf16.msra.mxu1 %v407_v59 }
 0x2bd   :  { %545 = vmatmul.mubr.msk.bf16.vlgmr.msra.gmra.mxu1 %vm72_vm4, %v397_v61 }
 0x36d   :  { %v195_v62 = vpop.f32.mrf.mxu1 }
 0x36f   :  { %v520_v63 = vpop.f32.mrf.mxu1 }
 0x371   :  { %v198_v0 = vpop.f32.mrf.mxu1 }
 0x373   :  { %v521_v1 = vpop.f32.mrf.mxu1 }
 0x375   :  { %v323_v2 = vpop.f32.mrf.mxu1 }
 0x376   :  { %v324_v3 = vadd.f32 %v323_v2, %v703_v25 }
 0x377   :  { %v532_v4 = vpop.f32.mrf.mxu1 }
 0x378   :  { %v329_v5 = vmax.f32 %v324_v3, 0.0 }
 0x379   :  { %v326_v7 = vpop.f32.mrf.mxu1 }
 0x37a   :  { %v330_v8 = vpack.c.bf16 %v329_v5, %v329_v5 }
 0x37b   :  { %v533_v9 = vpop.f32.mrf.mxu1 }
 0x37c   :  { %336 = vrot.lane.b32.xlu0 %v330_v8, %s606_s30  ;;  %v332_v10 = vrot.slane %v330_v8, 4 }
 0x37d   :  { %v443_v19 = vpop.f32.mrf.mxu1 }
 0x37e   :  { %333 = vrot.lane.b32.xlu1 %v332_v10, %s605_s29 }
 0x37f   :  { %v546_v22 = vpop.f32.mrf.mxu1 }
 0x381   :  { %v446_v24 = vpop.f32.mrf.mxu1 }
 0x383   :  { %v547_v25 = vpop.f32.mrf.mxu1 }
 0x3ee   :  { %v337_v11 = vpop.permute.xlu0 %336 }
 0x3ef   :  { %349 = vrot.lane.b32.xlu0 %v337_v11, %s609_s9 }
 0x3f0   :  { %v334_v12 = vpop.permute.xlu1 %333 }
 0x3f1   :  { %v335_v13 = vsel %vm45_vm1, %v710_v35, %v334_v12  ;;  %v342_v14 = vsel %vm57_vm3, %v330_v8, %v334_v12 }
 0x3f2   :  { %v339_v15 = vsel %vm57_vm3, 0, %v335_v13 }
 0x3f3   :  { %347 = vrot.lane.b32.xlu0 %v342_v14, %s609_s9  ;;  %345 = vrot.lane.b32.xlu1 %v339_v15, %s609_s9 }
 0x3f7   :  { %141 = vperm.xlu1 %558, %v34_v16   ;;  %206 = vperm.xlu0 %559, %v203_v17  }
 0x3fb   :  { %401 = vperm.xlu1 %558, %v203_v17  }
 0x461   :  { %v350_v26 = vpop.permute.xlu0 %349 }
 0x462   :  { %v354_v27 = vsel %vm57_vm3, %v350_v26, 0 }
 0x463   :  { %535 = vmatpush3.bf16.msra.mxu0 %v354_v27 }
 0x464   :  { %536 = vmatprep.subr.bf16.mxu0 %v607_v6 }
 0x465   :  { %v348_v28 = vpop.permute.xlu0 %347  ;;  %v346_v29 = vpop.permute.xlu1 %345 }
 0x466   :  { %v351_v30 = vsel %vm72_vm4, %v346_v29, %v348_v28 }
 0x467   :  { %537 = vmatpush3.bf16.msra.mxu0 %v351_v30 }
 0x46a   :  { %539 = vmatmul.mubr.msk.bf16.vlgmr.msra.gmra.mxu0 %vm154_vm7, %v733_v53 }
 0x472   :  { %v142_v31 = vpop.permute.xlu1 %141  ;;  %v207_v32 = vpop.permute.xlu0 %206 }
 0x473   :  { %v196_v33 = vadd.f32 %v195_v62, %v142_v31  ;;  %v250_v34 = vadd.f32 %v249_v18, %v207_v32 }
 0x475   :  { %v201_v35 = vmax.f32 %v196_v33, 0.0 }
 0x476   :  { %v402_v6 = vpop.permute.xlu1 %401 }
 0x477   :  { %256 = vst.msk [vmem:[#allocation2] sm:$0xff] %vm255_vm8, %v201_v35  ;;  %v257_v36 = vadd.f32 %v250_v34, %v201_v35  ;;  %v444_v41 = vadd.f32 %v443_v19, %v402_v6 }
 0x479   :  { %v258_v37 = vmax.f32 %v257_v36, 0.0 }
 0x47b   :  { %259 = vst.msk [vmem:[#allocation4] sm:$0xff] %vm255_vm8, %v258_v37 }
 0x52a   :  { %v390_v38 = vpop.f32.mrf.mxu0 }
 0x52b   :  { %v391_v39 = vadd.f32 %v390_v38, %v142_v31 }
 0x52c   :  { %v540_v40 = vpop.f32.mrf.mxu0 }
 0x52d   :  { %v396_v42 = vmax.f32 %v391_v39, 0.0 }
 0x52e   :  { %v393_v43 = vpop.f32.mrf.mxu0 }
 0x52f   :  { %450 = vst.msk [vmem:[#allocation2 + $0x8] sm:$0xff] %vm255_vm8, %v396_v42  ;;  %v451_v44 = vadd.f32 %v444_v41, %v396_v42 }
 0x530   :  { %v541_v45 = vpop.f32.mrf.mxu0 }
 0x531   :  { %571 = shalt.err (!%p568_p4)
}
 0x532   :  { %s612_s24 = smov 128   ;;  %s613_s25 = smov 8   ;;  %v452_v46 = vmax.f32 %v451_v44, 0.0 }
 0x533   :  { %466 = dma.vmem_to_hbm [thread:$0]  %s461_s6, 256, %s799_s7, [#allocation3], %s612_s24, %s612_s24, %s613_s25  }
 0x534   :  { %454 = vst.msk [vmem:[#allocation4 + $0x8] sm:$0xff] %vm255_vm8, %v452_v46  ;;  %s580_s28 = scalar_lea.vmem %s473_s22, 256  ;;  %p585_p6 = scmp.lt.s32.totalorder %s473_s22, %s473_s22 }
 0x535   :  { %p581_p5 = scmp.ne.s32.totalorder %s473_s22, %s580_s28  ;;  %p586_p7 = scmp.lt.s32.totalorder %s580_s28, %s580_s28 }
 0x537   :  { %p587_p8 = por %p586_p7, %p585_p6 }
 0x539   :  { %p588_p9 = pnand %p587_p8, %p581_p5 }
 0x53b   :  { %591 = shalt.err (!%p588_p9)
}
 0x53c   :  { %478 = dma.vmem_to_hbm [thread:$0]  %s473_s22, 256, %s800_s8, [#allocation5], %s612_s24, %s612_s24, %s613_s25  }
 0x53d   :  { %600 = dma.done.wait [#allocation3], 256  }
 0x53e   :  { %601 = vsyncadd [#allocation3], 4294967040 }
 0x53f   :  { %602 = dma.done.wait [#allocation5], 256  }
 0x540   :  { %603 = vsyncadd [#allocation5], 4294967040 }
 0x541   :  { %485 = vsyncpa [#allocation3], 1 }
 0x542   :  { %486 = vsyncpa [#allocation5], 1 }

// kernel: tpu_custom_call.1
= control target key start
LH: loop header
LB: loop body
LE: loop exit
PB: predicated region body
PF: predicated region fallthrough
CT: control target
= control target key end

     0   :  { %14 = vsyncpa [#allocation3], 0  ;;  %v604_v1 = vmov 0   ;;  %s792_s0 = inlined_call_operand.vmem [shape: f32[2,4,16], index: 0, kind: input, shape index: {}]   ;;  %s793_s1 = inlined_call_operand.vmem [shape: bf16[8,12], index: 1, kind: input, shape index: {}]   ;;  %s794_s2 = inlined_call_operand.vmem [shape: f32[8,1], index: 2, kind: input, shape index: {}]   ;;  %s795_s3 = inlined_call_operand.vmem [shape: bf16[8,24], index: 3, kind: input, shape index: {}]   ;;  %s796_s4 = inlined_call_operand.vmem [shape: f32[8,1], index: 4, kind: input, shape index: {}]   ;;  %s797_s5 = inlined_call_operand.vmem [shape: bf16[8,4], index: 5, kind: input, shape index: {}]   ;;  %s798_s6 = inlined_call_operand.vmem [shape: f32[8,1], index: 6, kind: input, shape index: {}]   ;;  %s799_s7 = inlined_call_operand.hbm [shape: f32[2,8,16], index: 7, kind: output, shape index: {0}]   ;;  %s800_s8 = inlined_call_operand.hbm [shape: f32[2,8,16], index: 8, kind: output, shape index: {1}]  }
   0x1   :  { %v35_v0 = vld [vmem:[%s792_s0] sm:$0xf]  ;;  %v39_v2 = vrot.slane %v604_v1, 6  ;;  %558 = vset.pattern.permute.xlu1 %v604_v1  ;;  %559 = vset.pattern.permute.xlu0 %v604_v1 }
   0x2   :  { %v662_v3 = vpack.c.bf16 %v35_v0, %v35_v0 }
   0x3   :  { %15 = vsyncpa [#allocation5], 0  ;;  %s605_s29 = smov 126   ;;  %s606_s30 = smov 124   ;;  %v607_v6 = vmov 0.0   ;;  %vm608_vm0 = vmmov 0  }
   0x4   :  { %41 = vrot.lane.b32.xlu0 %v39_v2, %s605_s29  ;;  %v40_v4 = vrot.slane %v662_v3, 6  ;;  %v47_v5 = vrot.slane %v662_v3, 4  ;;  %508 = vmatprep.subr.bf16.mxu0 %v607_v6  ;;  %vm45_vm1 = vcmask 1031168   ;;  %vm50_vm2 = vcmask 1041408   ;;  %s609_s9 = smov 4   ;;  %v33_v15 = vld [vmem:[%s794_s2] sm:$0xff] }
   0x5   :  { %514 = vmatprep.subr.bf16.mxu1 %v607_v6  ;;  %510 = vmatprep.mubr.msk.bf16.mxu0 %vm608_vm0, %v607_v6  ;;  %vm57_vm3 = vcmask 1043456   ;;  %v490_v16 = vld [vmem:[%s792_s0 + $0x4] sm:$0xf]  ;;  %v125_v17 = vrot.slane %v604_v1, 4  ;;  %vm72_vm4 = vcmask 31744   ;;  %vm78_vm5 = vcmask 1045504  }
   0x6   :  { %48 = vrot.lane.b32.xlu1 %v47_v5, %s606_s30  ;;  %518 = vmatprep.mubr.msk.bf16.mxu1 %vm608_vm0, %v607_v6  ;;  %v689_v18 = vpack.c.bf16 %v490_v16, %v490_v16  ;;  %v31_v24 = vld [vmem:[%s793_s1] sm:$0xf]  ;;  %vm74_vm6 = vcmask 97280   ;;  %vm154_vm7 = vcmask 195584   ;;  %v213_v58 = vsel %vm50_vm2, %v662_v3, 0  ;;  %s611_s21 = smov [#allocation4]  }
   0x7   :  { %v733_v53 = vld [vmem:[%s795_s3] sm:$0xf]  ;;  %vm255_vm8 = vcmask 130048   ;;  %s472_s22 = sshll.u32 %s611_s21, 4  ;;  %s473_s22 = int_to_ptr.vmem [resolvable:$true] %s472_s22 }
   0x8   :  { %43 = vrot.lane.b32.xlu0 %v40_v4, %s605_s29  ;;  %v264_v19 = vrot.slane %v689_v18, 6  ;;  %v268_v34 = vrot.slane %v689_v18, 4  ;;  %v407_v59 = vsel %vm50_vm2, %v689_v18, 0  ;;  %v202_v60 = vld [vmem:[%s797_s5] sm:$0xf] }
   0x9   :  { %v397_v61 = vld [vmem:[%s797_s5] sm:$0xf] }
   0xa   :  { %v34_v16 = vld [vmem:[%s796_s4] sm:$0xff]  ;;  %s610_s4 = smov [#allocation2]  }
  0x76   :  { %v42_v7 = vpop.permute.xlu0 %41 }
  0x78   :  { %v49_v8 = vpop.permute.xlu1 %48 }
  0x7a   :  { %v44_v9 = vpop.permute.xlu0 %43 }
  0x7b   :  { %v46_v10 = vsel %vm45_vm1, %v42_v7, %v44_v9  ;;  %v56_v11 = vsel %vm50_vm2, %v662_v3, %v44_v9 }
  0x7c   :  { %v53_v12 = vsel %vm50_vm2, 0, %v46_v10  ;;  %v60_v13 = vsel %vm57_vm3, %v56_v11, %v49_v8 }
  0x7d   :  { %70 = vrot.lane.b32.xlu0 %v60_v13, %s609_s9  ;;  %v59_v14 = vsel %vm57_vm3, %v53_v12, %v49_v8 }
  0x7e   :  { %68 = vrot.lane.b32.xlu1 %v59_v14, %s609_s9 }
  0x82   :  { %63 = vperm.xlu1 %558, %v33_v15  }
  0x86   :  { %127 = vrot.lane.b32.xlu1 %v125_v17, %s605_s29  ;;  %v203_v17 = vld [vmem:[%s798_s6] sm:$0xff]  ;;  %s460_s6 = sshll.u32 %s610_s4, 4  ;;  %s461_s6 = int_to_ptr.vmem [resolvable:$true] %s460_s6 }
  0x87   :  { %s560_s23 = scalar_lea.vmem %s461_s6, 256  ;;  %p565_p1 = scmp.lt.s32.totalorder %s461_s6, %s461_s6 }
  0x88   :  { %p561_p0 = scmp.ne.s32.totalorder %s461_s6, %s560_s23  ;;  %p566_p2 = scmp.lt.s32.totalorder %s560_s23, %s560_s23 }
  0x8a   :  { %265 = vrot.lane.b32.xlu1 %v264_v19, %s605_s29  ;;  %p567_p3 = por %p566_p2, %p565_p1 }
  0x8c   :  { %p568_p4 = pnand %p567_p3, %p561_p0 }
  0xef   :  { %v71_v20 = vpop.permute.xlu0 %70 }
  0xf0   :  { %v69_v21 = vpop.permute.xlu1 %68 }
  0xf1   :  { %v73_v22 = vsel %vm72_vm4, %v69_v21, %v71_v20 }
  0xf2   :  { %v80_v23 = vsel %vm78_vm5, %v73_v22, 0 }
  0xf3   :  { %509 = vmatpush3.bf16.msra.mxu0 %v80_v23 }
  0xf4   :  { %522 = vmatprep.subr.bf16.mxu0 %v607_v6 }
  0xf6   :  { %511 = vmatmul.mubr.msk.bf16.vlgmr.msra.gmra.mxu0 %vm74_vm6, %v31_v24 }
  0xf7   :  { %524 = vmatprep.mubr.msk.bf16.mxu0 %vm608_vm0, %v607_v6  ;;  %523 = vmatpush3.bf16.msra.mxu0 %v213_v58 }
  0xf8   :  { %534 = vmatprep.subr.bf16.mxu0 %v607_v6 }
  0xfd   :  { %v703_v25 = vpop.permute.xlu1 %63 }
  0xfe   :  { %525 = vmatmul.mubr.msk.bf16.vlgmr.msra.gmra.mxu0 %vm72_vm4, %v202_v60 }
  0xff   :  { %538 = vmatprep.mubr.msk.bf16.mxu0 %vm608_vm0, %v607_v6 }
 0x101   :  { %v710_v35 = vpop.permute.xlu1 %127 }
 0x105   :  { %v266_v37 = vpop.permute.xlu1 %265 }
 0x106   :  { %v267_v39 = vsel %vm45_vm1, %v42_v7, %v266_v37  ;;  %v275_v42 = vsel %vm50_vm2, %v689_v18, %v266_v37 }
 0x107   :  { %v272_v44 = vsel %vm50_vm2, 0, %v267_v39 }
 0x1b6   :  { %v116_v26 = vpop.f32.mrf.mxu0 }
 0x1b7   :  { %v117_v27 = vadd.f32 %v116_v26, %v703_v25 }
 0x1b8   :  { %v512_v28 = vpop.f32.mrf.mxu0 }
 0x1b9   :  { %v122_v29 = vmax.f32 %v117_v27, 0.0 }
 0x1ba   :  { %v119_v30 = vpop.f32.mrf.mxu0 }
 0x1bb   :  { %v123_v31 = vpack.c.bf16 %v122_v29, %v122_v29 }
 0x1bc   :  { %v513_v32 = vpop.f32.mrf.mxu0 }
 0x1bd   :  { %132 = vrot.lane.b32.xlu0 %v123_v31, %s606_s30  ;;  %v126_v33 = vrot.slane %v123_v31, 4 }
 0x1be   :  { %v249_v18 = vpop.f32.mrf.mxu0 }
 0x1c0   :  { %v526_v20 = vpop.f32.mrf.mxu0 }
 0x1c1   :  { %129 = vrot.lane.b32.xlu0 %v126_v33, %s605_s29 }
 0x1c2   :  { %v252_v21 = vpop.f32.mrf.mxu0 }
 0x1c4   :  { %v527_v23 = vpop.f32.mrf.mxu0 }
 0x1c5   :  { %269 = vrot.lane.b32.xlu0 %v268_v34, %s606_s30 }
 0x22f   :  { %v133_v36 = vpop.permute.xlu0 %132 }
 0x230   :  { %150 = vrot.lane.b32.xlu1 %v133_v36, %s609_s9 }
 0x233   :  { %v130_v38 = vpop.permute.xlu0 %129 }
 0x234   :  { %v131_v40 = vsel %vm45_vm1, %v710_v35, %v130_v38  ;;  %v138_v41 = vsel %vm57_vm3, %v123_v31, %v130_v38 }
 0x235   :  { %148 = vrot.lane.b32.xlu1 %v138_v41, %s609_s9  ;;  %v135_v43 = vsel %vm57_vm3, 0, %v131_v40 }
 0x236   :  { %146 = vrot.lane.b32.xlu0 %v135_v43, %s609_s9 }
 0x237   :  { %v270_v45 = vpop.permute.xlu0 %269 }
 0x238   :  { %v278_v46 = vsel %vm57_vm3, %v275_v42, %v270_v45  ;;  %v277_v47 = vsel %vm57_vm3, %v272_v44, %v270_v45 }
 0x239   :  { %283 = vrot.lane.b32.xlu1 %v278_v46, %s609_s9 }
 0x23a   :  { %281 = vrot.lane.b32.xlu0 %v277_v47, %s609_s9 }
 0x2a2   :  { %v151_v48 = vpop.permute.xlu1 %150 }
 0x2a3   :  { %v159_v49 = vsel %vm57_vm3, %v151_v48, 0 }
 0x2a4   :  { %515 = vmatpush3.bf16.msra.mxu1 %v159_v49 }
 0x2a5   :  { %516 = vmatprep.subr.bf16.mxu1 %v607_v6 }
 0x2a7   :  { %v149_v50 = vpop.permute.xlu1 %148 }
 0x2a8   :  { %v147_v51 = vpop.permute.xlu0 %146 }
 0x2a9   :  { %v152_v52 = vsel %vm72_vm4, %v147_v51, %v149_v50 }
 0x2aa   :  { %517 = vmatpush3.bf16.msra.mxu1 %v152_v52 }
 0x2ab   :  { %v284_v54 = vpop.permute.xlu1 %283  ;;  %528 = vmatprep.subr.bf16.mxu1 %v607_v6 }
 0x2ac   :  { %v282_v55 = vpop.permute.xlu0 %281 }
 0x2ad   :  { %v285_v56 = vsel %vm72_vm4, %v282_v55, %v284_v54  ;;  %519 = vmatmul.mubr.msk.bf16.vlgmr.msra.gmra.mxu1 %vm154_vm7, %v733_v53 }
 0x2ae   :  { %v287_v57 = vsel %vm78_vm5, %v285_v56, 0  ;;  %530 = vmatprep.mubr.msk.bf16.mxu1 %vm608_vm0, %v607_v6 }
 0x2af   :  { %529 = vmatpush3.bf16.msra.mxu1 %v287_v57 }
 0x2b0   :  { %542 = vmatprep.subr.bf16.mxu1 %v607_v6 }
 0x2b5   :  { %531 = vmatmul.mubr.msk.bf16.vlgmr.msra.gmra.mxu1 %vm74_vm6, %v31_v24 }
 0x2b6   :  { %544 = vmatprep.mubr.msk.bf16.mxu1 %vm608_vm0, %v607_v6  ;;  %543 = vmatpush3.bf16.msra.mxu1 %v407_v59 }
 0x2bd   :  { %545 = vmatmul.mubr.msk.bf16.vlgmr.msra.gmra.mxu1 %vm72_vm4, %v397_v61 }
 0x36d   :  { %v195_v62 = vpop.f32.mrf.mxu1 }
 0x36f   :  { %v520_v63 = vpop.f32.mrf.mxu1 }
 0x371   :  { %v198_v0 = vpop.f32.mrf.mxu1 }
 0x373   :  { %v521_v1 = vpop.f32.mrf.mxu1 }
 0x375   :  { %v323_v2 = vpop.f32.mrf.mxu1 }
 0x376   :  { %v324_v3 = vadd.f32 %v323_v2, %v703_v25 }
 0x377   :  { %v532_v4 = vpop.f32.mrf.mxu1 }
 0x378   :  { %v329_v5 = vmax.f32 %v324_v3, 0.0 }
 0x379   :  { %v326_v7 = vpop.f32.mrf.mxu1 }
 0x37a   :  { %v330_v8 = vpack.c.bf16 %v329_v5, %v329_v5 }
 0x37b   :  { %v533_v9 = vpop.f32.mrf.mxu1 }
 0x37c   :  { %336 = vrot.lane.b32.xlu0 %v330_v8, %s606_s30  ;;  %v332_v10 = vrot.slane %v330_v8, 4 }
 0x37d   :  { %v443_v19 = vpop.f32.mrf.mxu1 }
 0x37e   :  { %333 = vrot.lane.b32.xlu1 %v332_v10, %s605_s29 }
 0x37f   :  { %v546_v22 = vpop.f32.mrf.mxu1 }
 0x381   :  { %v446_v24 = vpop.f32.mrf.mxu1 }
 0x383   :  { %v547_v25 = vpop.f32.mrf.mxu1 }
 0x3ee   :  { %v337_v11 = vpop.permute.xlu0 %336 }
 0x3ef   :  { %349 = vrot.lane.b32.xlu0 %v337_v11, %s609_s9 }
 0x3f0   :  { %v334_v12 = vpop.permute.xlu1 %333 }
 0x3f1   :  { %v335_v13 = vsel %vm45_vm1, %v710_v35, %v334_v12  ;;  %v342_v14 = vsel %vm57_vm3, %v330_v8, %v334_v12 }
 0x3f2   :  { %v339_v15 = vsel %vm57_vm3, 0, %v335_v13 }
 0x3f3   :  { %347 = vrot.lane.b32.xlu0 %v342_v14, %s609_s9  ;;  %345 = vrot.lane.b32.xlu1 %v339_v15, %s609_s9 }
 0x3f7   :  { %141 = vperm.xlu1 %558, %v34_v16   ;;  %206 = vperm.xlu0 %559, %v203_v17  }
 0x3fb   :  { %401 = vperm.xlu1 %558, %v203_v17  }
 0x461   :  { %v350_v26 = vpop.permute.xlu0 %349 }
 0x462   :  { %v354_v27 = vsel %vm57_vm3, %v350_v26, 0 }
 0x463   :  { %535 = vmatpush3.bf16.msra.mxu0 %v354_v27 }
 0x464   :  { %536 = vmatprep.subr.bf16.mxu0 %v607_v6 }
 0x465   :  { %v348_v28 = vpop.permute.xlu0 %347  ;;  %v346_v29 = vpop.permute.xlu1 %345 }
 0x466   :  { %v351_v30 = vsel %vm72_vm4, %v346_v29, %v348_v28 }
 0x467   :  { %537 = vmatpush3.bf16.msra.mxu0 %v351_v30 }
 0x46a   :  { %539 = vmatmul.mubr.msk.bf16.vlgmr.msra.gmra.mxu0 %vm154_vm7, %v733_v53 }
 0x472   :  { %v142_v31 = vpop.permute.xlu1 %141  ;;  %v207_v32 = vpop.permute.xlu0 %206 }
 0x473   :  { %v196_v33 = vadd.f32 %v195_v62, %v142_v31  ;;  %v250_v34 = vadd.f32 %v249_v18, %v207_v32 }
 0x475   :  { %v201_v35 = vmax.f32 %v196_v33, 0.0 }
 0x476   :  { %v402_v6 = vpop.permute.xlu1 %401 }
 0x477   :  { %256 = vst.msk [vmem:[#allocation2] sm:$0xff] %vm255_vm8, %v201_v35  ;;  %v257_v36 = vadd.f32 %v250_v34, %v201_v35  ;;  %v444_v41 = vadd.f32 %v443_v19, %v402_v6 }
 0x479   :  { %v258_v37 = vmax.f32 %v257_v36, 0.0 }
 0x47b   :  { %259 = vst.msk [vmem:[#allocation4] sm:$0xff] %vm255_vm8, %v258_v37 }
 0x52a   :  { %v390_v38 = vpop.f32.mrf.mxu0 }
 0x52b   :  { %v391_v39 = vadd.f32 %v390_v38, %v142_v31 }
 0x52c   :  { %v540_v40 = vpop.f32.mrf.mxu0 }
 0x52d   :  { %v396_v42 = vmax.f32 %v391_v39, 0.0 }
 0x52e   :  { %v393_v43 = vpop.f32.mrf.mxu0 }
 0x52f   :  { %450 = vst.msk [vmem:[#allocation2 + $0x8] sm:$0xff] %vm255_vm8, %v396_v42  ;;  %v451_v44 = vadd.f32 %v444_v41, %v396_v42 }
 0x530   :  { %v541_v45 = vpop.f32.mrf.mxu0 }
 0x531   :  { %571 = shalt.err (!%p568_p4)
}
 0x532   :  { %s612_s24 = smov 128   ;;  %s613_s25 = smov 8   ;;  %v452_v46 = vmax.f32 %v451_v44, 0.0 }
 0x533   :  { %466 = dma.vmem_to_hbm [thread:$0]  %s461_s6, 256, %s799_s7, [#allocation3], %s612_s24, %s612_s24, %s613_s25  }
 0x534   :  { %454 = vst.msk [vmem:[#allocation4 + $0x8] sm:$0xff] %vm255_vm8, %v452_v46  ;;  %s580_s28 = scalar_lea.vmem %s473_s22, 256  ;;  %p585_p6 = scmp.lt.s32.totalorder %s473_s22, %s473_s22 }
 0x535   :  { %p581_p5 = scmp.ne.s32.totalorder %s473_s22, %s580_s28  ;;  %p586_p7 = scmp.lt.s32.totalorder %s580_s28, %s580_s28 }
 0x537   :  { %p587_p8 = por %p586_p7, %p585_p6 }
 0x539   :  { %p588_p9 = pnand %p587_p8, %p581_p5 }
 0x53b   :  { %591 = shalt.err (!%p588_p9)
}
 0x53c   :  { %478 = dma.vmem_to_hbm [thread:$0]  %s473_s22, 256, %s800_s8, [#allocation5], %s612_s24, %s612_s24, %s613_s25  }
 0x53d   :  { %600 = dma.done.wait [#allocation3], 256  }
 0x53e   :  { %601 = vsyncadd [#allocation3], 4294967040 }
 0x53f   :  { %602 = dma.done.wait [#allocation5], 256  }
 0x540   :  { %603 = vsyncadd [#allocation5], 4294967040 }
 0x541   :  { %485 = vsyncpa [#allocation3], 1 }
 0x542   :  { %486 = vsyncpa [#allocation5], 1 }

</bundles_post_ra>
